<compile_context>
chip_gen: v7x
topology: tpu7x:2x2x1
jax: 0.10.0
libtpu: 0.0.40
codegen_flags: <defaults>
</compile_context>

<pallas_src>
import math

import jax
import jax.numpy as jnp
from jax import lax
from jax.experimental import pallas as pl
from jax.experimental.pallas import tpu as pltpu


# Row-block size for the N x N operands (A, L_sym).  Use 512-1024 at realistic
# N; 8 keeps the toy example on the (8,128)-aligned path.
TM = 8
_VMEM_LIMIT = 64 * 1024 * 1024


def _const_spec(shape):
    zeros = (0,) * len(shape)
    return pl.BlockSpec(shape, lambda i, _z=zeros: _z)


def _ce_rows(logits, onehot):
    """Per-row cross entropy, shape [B, 1] (f32 math)."""
    mx = jnp.max(logits, axis=-1, keepdims=True)
    lse = mx + jnp.log(jnp.sum(jnp.exp(logits - mx), axis=-1, keepdims=True))
    return lse - jnp.sum(logits * onehot, axis=-1, keepdims=True)


# ----------------------------------------------------------------------------
# kernel 1: synthetic base (stand-in for the external `self.base` GNN)
#   grid over A row blocks ("parallel" -> uses both v7x TensorCores)
#   H = relu((A @ X) @ W_emb)   (F_in < D so this association is cheaper)
#   S = softmax(H @ W_s)
# ----------------------------------------------------------------------------
def _base_kernel(a_ref, x_ref, we_ref, ws_ref, h_ref, s_ref):
    ax = jnp.dot(a_ref[...], x_ref[...], preferred_element_type=jnp.float32)
    h = jnp.maximum(
        jnp.dot(ax.astype(jnp.bfloat16), we_ref[...],
                preferred_element_type=jnp.float32), 0.0)
    z = jnp.dot(h.astype(jnp.bfloat16), ws_ref[...],
                preferred_element_type=jnp.float32)
    z = z - jnp.max(z, axis=-1, keepdims=True)          # softmax in f32
    ez = jnp.exp(z)
    s = ez / jnp.sum(ez, axis=-1, keepdims=True)
    h_ref[...] = h.astype(jnp.bfloat16)                 # bf16 across kernels
    s_ref[...] = s


def fused_base(A, x, W_emb, W_s):
    N, F_in = x.shape
    D = W_emb.shape[1]
    K = W_s.shape[1]
    assert N % TM == 0
    nb = N // TM
    return pl.pallas_call(
        _base_kernel,
        out_shape=(jax.ShapeDtypeStruct((N, D), jnp.bfloat16),
                   jax.ShapeDtypeStruct((N, K), jnp.float32)),
        grid=(nb,),
        in_specs=[pl.BlockSpec((TM, N), lambda i: (i, 0)),   # A streamed
                  _const_spec((N, F_in)),                    # X resident
                  _const_spec((F_in, D)),
                  _const_spec((D, K))],
        out_specs=(pl.BlockSpec((TM, D), lambda i: (i, 0)),
                   pl.BlockSpec((TM, K), lambda i: (i, 0))),
        compiler_params=pltpu.CompilerParams(
            dimension_semantics=("parallel",),
            vmem_limit_bytes=_VMEM_LIMIT),
    )(A.astype(jnp.bfloat16), x.astype(jnp.bfloat16),
      W_emb.astype(jnp.bfloat16), W_s.astype(jnp.bfloat16))


# ----------------------------------------------------------------------------
# kernel 2: predictions + all five losses
#   grid over L_sym row blocks ("arbitrary" reduction axis)
#   memberships (G, GM, label one-hot) built in-kernel from int32 index columns
#   outputs: preds [B, 2C] f32, loss slab [8, 128] f32 (lane-dense)
#     lane 0: loss_1 (CE on pred1)          lane 3: feature loss (raw)
#     lane 1: loss_2 raw (pos-sample CE)    lane 4: prototype loss (raw)
#     lane 2: connectivity loss (raw)
# ----------------------------------------------------------------------------
def _loss_kernel(l_ref, s_ref, h_ref, batch_ref, comb_ref, lbl_ref, wc_ref,
                 pred_ref, slab_ref, sn_ref):
    step = pl.program_id(0)
    nsteps = pl.num_programs(0)
    N, K = s_ref.shape
    D = h_ref.shape[1]
    B = lbl_ref.shape[0]
    C = wc_ref.shape[1] // 2
    BK = B * K
    tm = l_ref.shape[0]

    lane = lax.broadcasted_iota(jnp.int32, (8, 128), 1)

    # ---- step 0: init outputs, build per-graph column-normalized Sn --------
    @pl.when(step == 0)
    def _():
        slab_ref[...] = jnp.zeros_like(slab_ref)
        pred_ref[...] = jnp.zeros_like(pred_ref)
        S = s_ref[...]
        G = (batch_ref[...] ==
             lax.broadcasted_iota(jnp.int32, (N, B), 1)).astype(jnp.float32)
        sq = S * S
        # col_norm[g, k] = ||S restricted to graph g, column k||_2
        col_norm = jnp.sqrt(
            lax.dot_general(G.astype(jnp.bfloat16), sq.astype(jnp.bfloat16),
                            (((0,), (0,)), ((), ())),
                            preferred_element_type=jnp.float32))
        denom = jnp.dot(G.astype(jnp.bfloat16), col_norm.astype(jnp.bfloat16),
                        preferred_element_type=jnp.float32) + 1e-5
        sn_ref[...] = S / denom

    # ---- every step: stream one L_sym row block, accumulate loss_sp --------
    row0 = pl.multiple_of(step * tm, tm)
    sn_blk = sn_ref[pl.ds(row0, tm), :]
    ls = jnp.dot(l_ref[...], sn_ref[...].astype(jnp.bfloat16),
                 preferred_element_type=jnp.float32)          # [tm, K]
    part = jnp.sum(sn_blk * ls)                               # tr(Sn^T L Sn) part
    slab_ref[...] += jnp.where(lane == 2, part, 0.0)

    # ---- last step: everything that needs the full S / H -------------------
    @pl.when(step == nsteps - 1)
    def _():
        S = s_ref[...]                        # [N, K] f32
        H16 = h_ref[...]                      # [N, D] bf16
        Hf = H16.astype(jnp.float32)
        Sn = sn_ref[...]
        batch_col = batch_ref[...]            # [N, 1] int32
        comb_col = comb_ref[...]              # [N, 1] int32
        lbl_col = lbl_ref[...]                # [B, 1] int32

        # memberships built on-chip (no dense one-hots in HBM)
        G = (batch_col ==
             lax.broadcasted_iota(jnp.int32, (N, B), 1)).astype(jnp.float32)
        GM = (comb_col ==
              lax.broadcasted_iota(jnp.int32, (N, BK), 1)).astype(jnp.float32)
        oh = (lbl_col ==
              lax.broadcasted_iota(jnp.int32, (B, C), 1)).astype(jnp.float32)

        # ---- pooled graph embedding and both prediction heads (one matmul) --
        counts = jnp.sum(G, axis=0)[:, None]                   # [B, 1]
        pooled = lax.dot_general(G.astype(jnp.bfloat16), H16,
                                 (((0,), (0,)), ((), ())),
                                 preferred_element_type=jnp.float32) / counts
        preds = jnp.dot(pooled.astype(jnp.bfloat16), wc_ref[...],
                        preferred_element_type=jnp.float32)    # [B, 2C]
        pred_ref[...] = preds
        p1 = preds[:, :C]
        p2 = preds[:, C:]

        # ---- cross-entropy losses ------------------------------------------
        loss_1 = jnp.mean(_ce_rows(p1, oh))
        # positive sample <=> true-class logit attains the row max (argmax match)
        true_logit = jnp.sum(p2 * oh, axis=-1, keepdims=True)
        pm = (true_logit >= jnp.max(p2, axis=-1, keepdims=True)).astype(jnp.float32)
        ce2 = _ce_rows(p2, oh)
        den2 = jnp.sum(pm)
        loss_2 = jnp.where(den2 > 0,
                           jnp.sum(pm * ce2) / jnp.maximum(den2, 1.0),
                           jnp.float32(0.0))

        # ---- connectivity orthogonality term --------------------------------
        ss = lax.dot_general(Sn.astype(jnp.bfloat16), Sn.astype(jnp.bfloat16),
                             (((0,), (0,)), ((), ())),
                             preferred_element_type=jnp.float32)   # [K, K]
        rk = lax.broadcasted_iota(jnp.int32, (K, K), 0)
        ck = lax.broadcasted_iota(jnp.int32, (K, K), 1)
        i_s = jnp.where(rk == ck, jnp.float32(B), jnp.float32(0.0))
        loss_ortho = jnp.sqrt(jnp.sum((ss - i_s) ** 2))

        # ---- ClusterFeature_loss (vectorized over B x K via GM) -------------
        cnt = jnp.sum(GM, axis=0)[:, None]                         # [BK, 1]
        safe_cnt = jnp.maximum(cnt, 1.0)
        sumH = lax.dot_general(GM.astype(jnp.bfloat16), H16,
                               (((0,), (0,)), ((), ())),
                               preferred_element_type=jnp.float32)  # [BK, D]
        h2 = jnp.sum(Hf * Hf, axis=-1, keepdims=True)               # [N, 1]
        sumh2 = lax.dot_general(GM.astype(jnp.bfloat16),
                                h2.astype(jnp.bfloat16),
                                (((0,), (0,)), ((), ())),
                                preferred_element_type=jnp.float32)  # [BK, 1]
        mean = sumH / safe_cnt               # == undivided sum (0) when cnt==0
        mdot = jnp.sum(mean * sumH, axis=-1, keepdims=True)
        mn2 = jnp.sum(mean * mean, axis=-1, keepdims=True)
        fd = jnp.maximum(sumh2 - 2.0 * mdot + cnt * mn2, 0.0) * (1.0 / D)
        feature_loss = jnp.sum(jnp.where(cnt > 0, fd / safe_cnt, 0.0))

        # per-graph pairwise cluster-mean distances via Gram matrix
        Gm = lax.dot_general(mean, mean, (((1,), (1,)), ((), ())),
                             preferred_element_type=jnp.float32)    # [BK, BK]
        rb = lax.broadcasted_iota(jnp.int32, (BK, BK), 0)
        cb = lax.broadcasted_iota(jnp.int32, (BK, BK), 1)
        diag = jnp.where(rb == cb, Gm, 0.0)
        d_col = jnp.sum(diag, axis=1, keepdims=True)
        d_row = jnp.sum(diag, axis=0, keepdims=True)
        pair_sq = jnp.maximum(d_col + d_row - 2.0 * Gm, 0.0)        # clamp
        same_graph_upper = (rb // K == cb // K) & (rb < cb)
        # reference folds `center_loss /= (K-1)` inside the per-graph loop:
        #   final = -sum_g cent_g * (K-1)^-(B-g)
        log_km1 = math.log(float(max(K - 1, 1)))
        w = jnp.exp(-(jnp.float32(B) - (rb // K).astype(jnp.float32)) * log_km1)
        center_fold = (-jnp.sum(jnp.where(same_graph_upper, pair_sq * w, 0.0))
                       * (1.0 / D))
        fea_raw = feature_loss + center_fold

        # ---- ClusterPrototype_loss (Q_flat == S, E_flat == H in the stand-in)
        loss1p = jnp.mean(jnp.min(1.0 - S, axis=0, keepdims=True))
        proto = lax.dot_general(S.astype(jnp.bfloat16), H16,
                                (((0,), (0,)), ((), ())),
                                preferred_element_type=jnp.float32)  # [K, D]
        countp = jnp.sum(S, axis=0)[:, None] + 0.1
        proto = proto / countp
        pnorm = jnp.sqrt(jnp.sum(proto * proto, axis=-1, keepdims=True))
        proto = proto / (pnorm + 1e-15)
        PPt = lax.dot_general(proto, proto, (((1,), (1,)), ((), ())),
                              preferred_element_type=jnp.float32)    # [K, K]
        pdiag = jnp.where(rk == ck, PPt, 0.0)
        pd_col = jnp.sum(pdiag, axis=1, keepdims=True)
        pd_row = jnp.sum(pdiag, axis=0, keepdims=True)
        psq = jnp.maximum(pd_col + pd_row - 2.0 * PPt, 0.0)          # clamp
        centerp = -jnp.sum(jnp.where(rk < ck, psq, 0.0)) * (1.0 / D)
        centerp = centerp / (K * (K - 1) / 2)
        proto_raw = loss1p + centerp

        # ---- add the remaining lanes of the lane-dense slab ------------------
        adds = jnp.zeros((8, 128), jnp.float32)
        for idx, val in enumerate((loss_1, loss_2, loss_ortho,
                                   fea_raw, proto_raw)):
            adds = jnp.where(lane == idx, val, adds)
        slab_ref[...] += adds


def fused_losses(L_sym, S, H16, batch_idx, comb_idx, labels, W_c12):
    N, K = S.shape
    D = H16.shape[1]
    B = labels.shape[0]
    C2 = W_c12.shape[1]
    assert N % TM == 0
    nb = N // TM
    return pl.pallas_call(
        _loss_kernel,
        out_shape=(jax.ShapeDtypeStruct((B, C2), jnp.float32),
                   jax.ShapeDtypeStruct((8, 128), jnp.float32)),
        grid=(nb,),
        in_specs=[pl.BlockSpec((TM, N), lambda i: (i, 0)),   # L_sym streamed
                  _const_spec((N, K)),                       # S resident
                  _const_spec((N, D)),                       # H (bf16) resident
                  _const_spec((N, 1)),                       # batch idx
                  _const_spec((N, 1)),                       # batch*K + cat
                  _const_spec((B, 1)),                       # labels
                  _const_spec((D, C2))],                     # [W_c1 | W_c2]
        out_specs=(_const_spec((B, C2)),
                   _const_spec((8, 128))),
        scratch_shapes=[pltpu.VMEM((N, K), jnp.float32)],    # Sn, resident
        compiler_params=pltpu.CompilerParams(
            dimension_semantics=("arbitrary",),              # reduction axis
            vmem_limit_bytes=_VMEM_LIMIT),
    )(L_sym.astype(jnp.bfloat16), S, H16, batch_idx, comb_idx, labels,
      W_c12.astype(jnp.bfloat16))


# ----------------------------------------------------------------------------
# CIFlow forward
# ----------------------------------------------------------------------------
def ciflow_forward(is_test, A, L_sym, W_emb, x, y, batch, params, args, key,
                   *, n_graphs):
    K = params["W_s"].shape[1]
    C = params["W_c1"].shape[1]

    # --- synthetic `self.base` ---------------------------------------------
    # TODO(synk): the real GNN backbone (`self.base` / `get_emb`) is external
    # to this module; a deterministic GCN-style stand-in produces H and S.
    H16, S = fused_base(A, x, W_emb, params["W_s"])

    labels = y.reshape(-1).astype(jnp.int32)
    # detached torch.multinomial(S, 1) equivalent (device-side, no host sync)
    sample_cat = jax.random.categorical(key, jnp.log(S + 1e-30), axis=-1)
    batch_i32 = batch.astype(jnp.int32)
    comb = batch_i32 * K + sample_cat.astype(jnp.int32)      # graph*K + cluster

    W_c12 = jnp.concatenate([params["W_c1"], params["W_c2"]], axis=1)

    preds, slab = fused_losses(L_sym, S, H16, batch_i32[:, None],
                               comb[:, None], labels[:, None], W_c12)
    pred1 = preds[:, :C]
    pred2 = preds[:, C:]

    loss_1 = slab[0, 0]
    loss_2_raw = slab[0, 1]
    con_raw = slab[0, 2]
    fea_raw = slab[0, 3]
    proto_raw = slab[0, 4]

    length = jnp.float32(n_graphs)                           # static, no sync
    loss_2 = args["lambda_2"] * loss_2_raw
    con_loss = args["lambda_con"] * con_raw / length
    fea_loss = args["lambda_fea"] * fea_raw / length
    proto_loss = args["lambda_proto"] * proto_raw
    loss = loss_1 + loss_2 + con_loss + fea_loss + proto_loss

    pred_fidelity_m = pred1
    pred_fidelity_1_m = pred2
    sparsity = jnp.float32(0.5)
    important_nodes = jnp.argmax(S, axis=-1)

    # device scalars (no .item() -> forward stays jittable end to end)
    loss_dict = {"loss": loss, "pred_loss": loss_1}
    return (loss, loss_dict, pred1, pred2, pred_fidelity_m,
            pred_fidelity_1_m, sparsity, important_nodes)


# ----------------------------------------------------------------------------
# main
# ----------------------------------------------------------------------------
if __name__ == "__main__":
    n_graphs, nodes_per_graph = 2, 8
    N = n_graphs * nodes_per_graph            # 16 nodes total
    F_in, D, K, C = 8, 32, 4, 3               # feat, hidden, clusters, classes

    key = jax.random.PRNGKey(0)
    kx, kw, ks, k1, k2, ky, ksamp = jax.random.split(key, 7)

    x = jax.random.normal(kx, (N, F_in), jnp.float32)
    W_emb = jax.random.normal(kw, (F_in, D), jnp.float32) * 0.3
    params = {
        "W_s": jax.random.normal(ks, (D, K), jnp.float32) * 0.3,
        "W_c1": jax.random.normal(k1, (D, C), jnp.float32) * 0.3,
        "W_c2": jax.random.normal(k2, (D, C), jnp.float32) * 0.3,
    }
    y = jax.random.randint(ky, (n_graphs,), 0, C)
    batch = jnp.repeat(jnp.arange(n_graphs, dtype=jnp.int32), nodes_per_graph)

    # block-diagonal ring adjacency with self loops (deterministic)
    A = jnp.zeros((N, N), jnp.float32)
    for g in range(n_graphs):
        off = g * nodes_per_graph
        for n in range(nodes_per_graph):
            i = off + n
            j = off + (n + 1) % nodes_per_graph
            A = A.at[i, i].set(1.0)
            A = A.at[i, j].set(1.0)
            A = A.at[j, i].set(1.0)
    deg = jnp.sum(A, axis=1)
    dinv = 1.0 / jnp.sqrt(jnp.maximum(deg, 1.0))
    L_sym = jnp.eye(N, dtype=jnp.float32) - dinv[:, None] * A * dinv[None, :]

    args = {"lambda_2": 0.5, "lambda_con": 0.1, "lambda_fea": 0.1,
            "lambda_proto": 0.1}

    out = ciflow_forward(False, A, L_sym, W_emb, x, y, batch, params, args,
                         ksamp, n_graphs=n_graphs)
    jax.block_until_ready(out[0])
    print("KERNEL_OK")
</pallas_src>

<mosaic_0001>
module attributes {stable_mosaic.version = 11 : i64} {
  func.func @_base_kernel(%arg0: i32, %arg1: memref<8x16xbf16, #tpu.memory_space<vmem>>, %arg2: memref<16x8xbf16, #tpu.memory_space<vmem>>, %arg3: memref<8x32xbf16, #tpu.memory_space<vmem>>, %arg4: memref<32x4xbf16, #tpu.memory_space<vmem>>, %arg5: memref<8x32xbf16, #tpu.memory_space<vmem>>, %arg6: memref<8x4xf32, #tpu.memory_space<vmem>>) attributes {dimension_semantics = [#tpu.dimension_semantics<parallel>], iteration_bounds = array<i64: 2>, scalar_prefetch = 0 : i64, scratch_operands = 0 : i64, tpu.core_type = #tpu.core_type<tc>, window_params = [{transform_indices = @transform_0, window_bounds = array<i64: 8, 16>}, {pipeline_mode = #tpu.pipeline_mode<synchronous>, transform_indices = @transform_1, window_bounds = array<i64: 16, 8>}, {pipeline_mode = #tpu.pipeline_mode<synchronous>, transform_indices = @transform_2, window_bounds = array<i64: 8, 32>}, {pipeline_mode = #tpu.pipeline_mode<synchronous>, transform_indices = @transform_3, window_bounds = array<i64: 32, 4>}, {transform_indices = @transform_4, window_bounds = array<i64: 8, 32>}, {transform_indices = @transform_5, window_bounds = array<i64: 8, 4>}]} {
    %c0 = arith.constant 0 : index
    %c0_0 = arith.constant 0 : index
    %0 = vector.load %arg1[%c0, %c0_0] : memref<8x16xbf16, #tpu.memory_space<vmem>>, vector<8x16xbf16>
    %c0_1 = arith.constant 0 : index
    %c0_2 = arith.constant 0 : index
    %1 = vector.load %arg2[%c0_1, %c0_2] : memref<16x8xbf16, #tpu.memory_space<vmem>>, vector<16x8xbf16>
    %cst = arith.constant dense<0.000000e+00> : vector<8x8xf32>
    %2 = tpu.matmul %0, %1, %cst {dimension_numbers = #tpu.dot_dimension_numbers<[1], [0], [0], [1], [0, 0, 1, 1], [], []>} : vector<8x16xbf16>, vector<16x8xbf16>, vector<8x8xf32> -> vector<8x8xf32>
    %3 = arith.truncf %2 : vector<8x8xf32> to vector<8x8xbf16>
    %c0_3 = arith.constant 0 : index
    %c0_4 = arith.constant 0 : index
    %4 = vector.load %arg3[%c0_3, %c0_4] : memref<8x32xbf16, #tpu.memory_space<vmem>>, vector<8x32xbf16>
    %cst_5 = arith.constant dense<0.000000e+00> : vector<8x32xf32>
    %5 = tpu.matmul %3, %4, %cst_5 {dimension_numbers = #tpu.dot_dimension_numbers<[1], [0], [0], [1], [0, 0, 1, 1], [], []>} : vector<8x8xbf16>, vector<8x32xbf16>, vector<8x32xf32> -> vector<8x32xf32>
    %cst_6 = arith.constant 0.000000e+00 : f32
    %6 = vector.broadcast %cst_6 : f32 to vector<8x32xf32>
    %7 = arith.maximumf %5, %6 : vector<8x32xf32>
    %8 = arith.truncf %7 : vector<8x32xf32> to vector<8x32xbf16>
    %c0_7 = arith.constant 0 : index
    %c0_8 = arith.constant 0 : index
    %9 = vector.load %arg4[%c0_7, %c0_8] : memref<32x4xbf16, #tpu.memory_space<vmem>>, vector<32x4xbf16>
    %cst_9 = arith.constant dense<0.000000e+00> : vector<8x4xf32>
    %10 = tpu.matmul %8, %9, %cst_9 {dimension_numbers = #tpu.dot_dimension_numbers<[1], [0], [0], [1], [0, 0, 1, 1], [], []>} : vector<8x32xbf16>, vector<32x4xbf16>, vector<8x4xf32> -> vector<8x4xf32>
    %cst_10 = arith.constant dense<0xFF800000> : vector<8xf32>
    %11 = vector.multi_reduction <maximumf>, %10, %cst_10 [1] : vector<8x4xf32> to vector<8xf32>
    %12 = vector.shape_cast %11 : vector<8xf32> to vector<8x1xf32>
    %13 = vector.broadcast %12 : vector<8x1xf32> to vector<8x4xf32>
    %14 = arith.subf %10, %13 : vector<8x4xf32>
    %15 = math.exp %14 : vector<8x4xf32>
    %cst_11 = arith.constant dense<0.000000e+00> : vector<8xf32>
    %16 = vector.multi_reduction <add>, %15, %cst_11 [1] : vector<8x4xf32> to vector<8xf32>
    %17 = vector.shape_cast %16 : vector<8xf32> to vector<8x1xf32>
    %18 = vector.broadcast %17 : vector<8x1xf32> to vector<8x4xf32>
    %19 = arith.divf %15, %18 : vector<8x4xf32>
    %20 = arith.truncf %7 : vector<8x32xf32> to vector<8x32xbf16>
    %c0_12 = arith.constant 0 : index
    %c0_13 = arith.constant 0 : index
    %21 = vector.load %arg5[%c0_12, %c0_13] : memref<8x32xbf16, #tpu.memory_space<vmem>>, vector<8x32xbf16>
    tpu.vector_store %arg5[%c0_12, %c0_13], %20 {strides = array<i32>} : memref<8x32xbf16, #tpu.memory_space<vmem>>, vector<8x32xbf16>,
    %c0_14 = arith.constant 0 : index
    %c0_15 = arith.constant 0 : index
    %22 = vector.load %arg6[%c0_14, %c0_15] : memref<8x4xf32, #tpu.memory_space<vmem>>, vector<8x4xf32>
    tpu.vector_store %arg6[%c0_14, %c0_15], %19 {strides = array<i32>} : memref<8x4xf32, #tpu.memory_space<vmem>>, vector<8x4xf32>,
    return
  }
  func.func @transform_0(%arg0: i32) -> (i32, i32) {
    %c0_i32 = arith.constant 0 : i32
    %c0_i32_0 = arith.constant 0 : i32
    return %arg0, %c0_i32 : i32, i32
  }
  func.func @transform_1(%arg0: i32) -> (i32, i32) {
    %c0_i32 = arith.constant 0 : i32
    %c0_i32_0 = arith.constant 0 : i32
    %c0_i32_1 = arith.constant 0 : i32
    return %c0_i32, %c0_i32_0 : i32, i32
  }
  func.func @transform_2(%arg0: i32) -> (i32, i32) {
    %c0_i32 = arith.constant 0 : i32
    %c0_i32_0 = arith.constant 0 : i32
    %c0_i32_1 = arith.constant 0 : i32
    return %c0_i32, %c0_i32_0 : i32, i32
  }
  func.func @transform_3(%arg0: i32) -> (i32, i32) {
    %c0_i32 = arith.constant 0 : i32
    %c0_i32_0 = arith.constant 0 : i32
    %c0_i32_1 = arith.constant 0 : i32
    return %c0_i32, %c0_i32_0 : i32, i32
  }
  func.func @transform_4(%arg0: i32) -> (i32, i32) {
    %c0_i32 = arith.constant 0 : i32
    %c0_i32_0 = arith.constant 0 : i32
    return %arg0, %c0_i32 : i32, i32
  }
  func.func @transform_5(%arg0: i32) -> (i32, i32) {
    %c0_i32 = arith.constant 0 : i32
    %c0_i32_0 = arith.constant 0 : i32
    return %arg0, %c0_i32 : i32, i32
  }
}

</mosaic_0001>

<bundles_post_ra>
// kernel: tpu_custom_call.1
= control target key start
LH: loop header
LB: loop body
LE: loop exit
PB: predicated region body
PF: predicated region fallthrough
CT: control target
= control target key end

     0   :  { %11 = vsyncpa [#allocation3], 0  ;;  %s1338_s0 = inlined_call_operand.hbm [shape: bf16[16,16], index: 0, kind: input, shape index: {}]   ;;  %s1339_s1 = inlined_call_operand.hbm [shape: bf16[16,8], index: 1, kind: input, shape index: {}]   ;;  %s1340_s2 = inlined_call_operand.hbm [shape: bf16[8,32], index: 2, kind: input, shape index: {}]   ;;  %s1341_s3 = inlined_call_operand.hbm [shape: bf16[32,4], index: 3, kind: input, shape index: {}]   ;;  %s1342_s4 = inlined_call_operand.hbm [shape: bf16[16,32], index: 4, kind: output, shape index: {0}]   ;;  %s1343_s5 = inlined_call_operand.hbm [shape: f32[16,4], index: 5, kind: output, shape index: {1}]  }
   0x1   :  { %13 = vsyncpa [#allocation3 + $0x1], 0 }
   0x2   :  { %14 = vsyncpa [#allocation6], 0 }
   0x3   :  { %15 = vsyncpa [#allocation9], 0 }
   0x4   :  { %16 = vsyncpa [#allocation4], 0 }
   0x5   :  { %18 = vsyncpa [#allocation4 + $0x1], 0 }
   0x6   :  { %19 = vsyncpa [#allocation12], 0 }
   0x7   :  { %21 = vsyncpa [#allocation12 + $0x1], 0  ;;  %s1046_s18 = smov 0   ;;  %s1048_s19 = smov 0  }
   0x8   :  { %s1050_s20 = smov 0   ;;  %s1052_s21 = smov 0  }
   0x9 LB: > { %s1067_s22 = sadd.s32 4294967295, %s1004_s21   ;;  %s637_s23 = sadd.s32 4294967294, %s1004_s21   ;;  %s1004_s21 = sphi %s1052_s21, %s1366_s21   ;;  %s1000_s20 = sphi %s1050_s20, %s1365_s20   ;;  %s996_s19 = sphi %s1048_s19, %s1364_s19   ;;  %s992_s18 = sphi %s1046_s18, %s1363_s18  }
   0xa   : > { %p47_p0 = scmp.ne.s32.totalorder %s996_s19, %s992_s18  ;;  %p1344_p1 = scmp.eq.s32.totalorder %s1067_s22, 0 }
   0xb   : > { %p140_p3 = scmp.eq.s32.totalorder %s637_s23, 1  ;;  %p638_p5 = scmp.ge.s32.totalorder %s1004_s21, 1 }
   0xc   : > { %p1076_p4 = por %p1344_p1, %p47_p0  ;;  %p173_p7 = scmp.lt.s32.totalorder %s1004_s21, 3 }
   0xd   : > { %p1081_p6 = por %p140_p3, %p47_p0  ;;  %s1006_s27 = smov [#allocation5]  }
   0xe   : > { %s1347_s24 = scalar_select %p1076_p4, 1, 0 }
   0xf   : > { %s1348_s25 = scalar_select %p1081_p6, 1, 0 }
  0x10   : > { %p1086_p8 = pnand %p638_p5, %p173_p7  ;;  %s185_s28 = sshll.u32 %s1006_s27, 4  ;;  %s1090_s28 = int_to_ptr.vmem [resolvable:$true] %s185_s28 }
  0x11   : > { %s1007_s30 = smov [#allocation7]   ;;  %s1008_s7 = smov [#allocation8]  }
  0x12   : > { %s1349_s26 = scalar_select %p1086_p8, 1, 0 }
  0x13   : > { %p709_p9 = pneg %p1086_p8  ;;  %s199_s6 = sshll.u32 %s1007_s30, 4  ;;  %s1101_s6 = int_to_ptr.vmem [resolvable:$true] %s199_s6 }
  0x14   : > { %s1103_s8 = sshll.u32 %s1008_s7, 4  ;;  %s784_s11 = scalar_lea.hbm %s1339_s1, 128  ;;  %s210_s8 = int_to_ptr.vmem [resolvable:$true] %s1103_s8 }
  0x15   : > { %p1097_p11 = pnand %p709_p9, %p1344_p1  ;;  %p785_p12 = scmp.ne.s32.totalorder %s1339_s1, %s784_s11 }
  0x16   : > { %p791_p5 = scmp.lt.u32.totalorder %s784_s11, %s1339_s1 }
  0x17   : > { %p1113_p13 = pneg %p1097_p11 }
  0x19   : > { %p787_p0 = pnand %p1113_p13, %p785_p12 }
  0x1b   : > { %p788_p3 = pneg %p787_p0 }
  0x1d   : > { %p793_p7 = pnand %p791_p5, %p788_p3 }
  0x1f   : > { %796 = shalt.err (!%p793_p7)
}
  0x20   : > { %s797_s17 = scalar_lea.vmem %s1090_s28, 128  ;;  %p805_p2 = scmp.lt.s32.totalorder %s1090_s28, %s1090_s28 }
  0x21   : > { %p798_p9 = scmp.ne.s32.totalorder %s1090_s28, %s797_s17  ;;  %p806_p6 = scmp.lt.s32.totalorder %s797_s17, %s797_s17 }
  0x23   : > { %p800_p10 = pnand %p798_p9, %p1113_p13  ;;  %p807_p12 = por %p806_p6, %p805_p2 }
  0x25   : > { %p801_p1 = pneg %p800_p10 }
  0x27   : > { %p808_p0 = pnand %p807_p12, %p801_p1 }
  0x29   : > { %811 = shalt.err (!%p808_p0)
}
  0x2a   : > { %s1009_s23 = smov 64   ;;  %s1010_s27 = smov 4  }
  0x2b   : > { %712 = dma.hbm_to_vmem [thread:$0]  (!%p1097_p11), %s1339_s1, 128, %s1090_s28, [#allocation6], %s1009_s23, %s1009_s23, %s1010_s27  }
  0x2c   : > { %s812_s11 = scalar_lea.hbm %s1340_s2, 64 }
  0x2d   : > { %p813_p1 = scmp.ne.s32.totalorder %s1340_s2, %s812_s11  ;;  %p819_p10 = scmp.lt.u32.totalorder %s812_s11, %s1340_s2 }
  0x2f   : > { %p815_p2 = pnand %p813_p1, %p1113_p13 }
  0x31   : > { %p816_p6 = pneg %p815_p2 }
  0x33   : > { %p821_p3 = pnand %p819_p10, %p816_p6 }
  0x35   : > { %824 = shalt.err (!%p821_p3)
}
  0x36   : > { %s825_s28 = scalar_lea.vmem %s1101_s6, 64  ;;  %p833_p12 = scmp.lt.s32.totalorder %s1101_s6, %s1101_s6 }
  0x37   : > { %p826_p5 = scmp.ne.s32.totalorder %s1101_s6, %s825_s28  ;;  %p834_p0 = scmp.lt.s32.totalorder %s825_s28, %s825_s28 }
  0x39   : > { %p828_p7 = pnand %p826_p5, %p1113_p13  ;;  %p835_p1 = por %p834_p0, %p833_p12 }
  0x3b   : > { %p829_p9 = pneg %p828_p7 }
  0x3d   : > { %p836_p2 = pnand %p835_p1, %p829_p9 }
  0x3f   : > { %839 = shalt.err (!%p836_p2)
}
  0x40   : > { %715 = dma.hbm_to_vmem [thread:$0]  (!%p1097_p11), %s1340_s2, 64, %s1101_s6, [#allocation6]  }
  0x41   : > { %s840_s10 = scalar_lea.hbm %s1341_s3, 256 }
  0x42   : > { %p841_p6 = scmp.ne.s32.totalorder %s1341_s3, %s840_s10  ;;  %p847_p5 = scmp.lt.u32.totalorder %s840_s10, %s1341_s3 }
  0x44   : > { %p843_p10 = pnand %p841_p6, %p1113_p13 }
  0x46   : > { %p844_p3 = pneg %p843_p10 }
  0x48   : > { %p849_p7 = pnand %p847_p5, %p844_p3 }
  0x4a   : > { %852 = shalt.err (!%p849_p7)
}
  0x4b   : > { %s853_s16 = scalar_lea.vmem %s210_s8, 256  ;;  %p861_p1 = scmp.lt.s32.totalorder %s210_s8, %s210_s8 }
  0x4c   : > { %p854_p9 = scmp.ne.s32.totalorder %s210_s8, %s853_s16  ;;  %p862_p2 = scmp.lt.s32.totalorder %s853_s16, %s853_s16 }
  0x4e   : > { %p856_p12 = pnand %p854_p9, %p1113_p13  ;;  %p863_p4 = por %p862_p2, %p861_p1 }
  0x50   : > { %p857_p0 = pneg %p856_p12 }
  0x52   : > { %p864_p8 = pnand %p863_p4, %p857_p0 }
  0x54   : > { %867 = shalt.err (!%p864_p8)
}
  0x55   : > { %718 = dma.hbm_to_vmem [thread:$0]  (!%p1097_p11), %s1341_s3, 256, %s210_s8, [#allocation9], %s1009_s23, %s1009_s23, %s1010_s27  }
  0x56   : > { %s1183_s14 = sadd.s32 1, %s1004_s21   ;;  %s34_s17 = sadd.s32 1, %s1000_s20 }
  0x57   : > { %s31_s29 = ssub.s32 %s1004_s21, %s1183_s14  ;;  %p41_p8 = scmp.ne.s32.totalorder %s1000_s20, %s996_s19 }
  0x58   : > { %p32_p4 = scmp.eq.s32.totalorder %s31_s29, 0  ;;  %p42_p13 = scmp.eq.s32.totalorder %s1004_s21, 0 }
  0x59   : > { %p733_p6 = scmp.lt.s32.totalorder %s1004_s21, 2  ;;  %p1352_p3 = scmp.eq.s32.totalorder %s1067_s22, 1 }
  0x5a   : > { %s1193_s30 = scalar_select %p32_p4, %s1000_s20, %s34_s17  }
  0x5b   : > { %p43_p10 = por %p42_p13, %p41_p8  ;;  %p1197_p5 = por %p1352_p3, %p41_p8 }
  0x5c   : > { %s223_s9 = sand.u32 1, %s1000_s20   ;;  %s644_s10 = sshll.u32 %s1004_s21, 6 }
  0x5d   : > { %s643_s8 = sshll.u32 %s223_s9, 2  ;;  %s1206_s11 = scalar_lea.hbm %s1338_s0, %s644_s10 }
  0x5e   : > { %s227_s12 = scalar_lea.vmem [#allocation2], %s643_s8  ;;  %p1208_p11 = pnand %p733_p6, %p43_p10 }
  0x5f   : > { %s234_s13 = sshll.u32 %s227_s12, 4  ;;  %s224_s16 = scalar_lea.sflag [#allocation3], %s223_s9  ;;  %s1212_s13 = int_to_ptr.vmem [resolvable:$true] %s234_s13 }
  0x60   : > { %s868_s6 = scalar_lea.hbm %s1206_s11, 64  ;;  %p870_p9 = pneg %p1208_p11 }
  0x61   : > { %p869_p7 = scmp.ne.s32.totalorder %s1206_s11, %s868_s6  ;;  %s873_s17 = scalar_lea.hbm %s1338_s0, 128 }
  0x62   : > { %p874_p1 = scmp.lt.u32.totalorder %s1206_s11, %s1338_s0  ;;  %p875_p2 = scmp.lt.u32.totalorder %s873_s17, %s868_s6 }
  0x63   : > { %p871_p12 = pnand %p870_p9, %p869_p7  ;;  %p877_p8 = scmp.lt.u32.totalorder %s868_s6, %s1206_s11 }
  0x64   : > { %p876_p4 = por %p875_p2, %p874_p1 }
  0x65   : > { %p872_p0 = pneg %p871_p12 }
  0x66   : > { %p878_p13 = por %p877_p8, %p876_p4 }
  0x68   : > { %p879_p6 = pnand %p878_p13, %p872_p0 }
  0x6a   : > { %882 = shalt.err (!%p879_p6)
}
  0x6b   : > { %s883_s9 = scalar_lea.vmem %s1212_s13, 64  ;;  %s1011_s23 = smov [#allocation2]  }
  0x6c   : > { %p884_p10 = scmp.ne.s32.totalorder %s1212_s13, %s883_s9  ;;  %s888_s27 = sshll.u32 %s1011_s23, 4  ;;  %s889_s27 = int_to_ptr.vmem [resolvable:$false] %s888_s27 }
  0x6d   : > { %s890_s12 = scalar_lea.vmem %s889_s27, 128  ;;  %p891_p12 = scmp.lt.s32.totalorder %s1212_s13, %s889_s27 }
  0x6e   : > { %p886_p3 = pnand %p884_p10, %p870_p9  ;;  %p892_p1 = scmp.lt.s32.totalorder %s890_s12, %s883_s9 }
  0x70   : > { %p887_p7 = pneg %p886_p3  ;;  %p893_p2 = por %p892_p1, %p891_p12 }
  0x72   : > { %p894_p4 = pnand %p893_p2, %p887_p7 }
  0x74   : > { %897 = shalt.err (!%p894_p4)
}
  0x75   : > { %722 = dma.hbm_to_vmem [thread:$0]  (!%p1208_p11), %s1206_s11, 64, %s1212_s13, %s224_s16  }
  0x76   : > { %p1355_p0 = scmp.ne.s32.totalorder %s1349_s26, 0 }
  0x77   : > { %s1242_s6 = sand.u32 (!%p1355_p0), 1, %s996_s19   ;;  %p1356_p9 = scmp.ne.s32.totalorder (!%p1355_p0), %s1347_s24, 0 }
  0x78   : > { %243 = sbr.rel (%p1355_p0) target bundleno = 1111 (0x457), region = 36  ;;  %s646_s28 = sshll.u32 (!%p1355_p0), %s1242_s6, 2 }
  0x79   : > { %s246_s29 = scalar_lea.sflag (!%p1355_p0), [#allocation3], %s1242_s6  ;;  %s249_s17 = scalar_lea.vmem (!%p1355_p0), [#allocation2], %s646_s28 }
  0x7f   : > { %971 = dma.done.wait (%p1356_p9), %s246_s29, 64  }
  0x80   : > { %973 = vsyncadd (%p1356_p9), %s246_s29, 4294967232  ;;  %p1357_p11 = scmp.eq.s32.totalorder %s1067_s22, 0 }
  0x82   : > { %975 = dma.done.wait (%p1357_p11), [#allocation6], 192   ;;  %p1358_p8 = pmov %p1357_p11 }
  0x84   : > { %977 = vsyncadd (%p1358_p8), [#allocation6], 4294967104  ;;  %p1359_p13 = pmov %p1358_p8 }
  0x85   : > { %p1360_p6 = pmov %p1358_p8 }
  0x86   : > { %979 = dma.done.wait (%p1359_p13), [#allocation9], 256  }
  0x87   : > { %981 = vsyncadd (%p1360_p6), [#allocation9], 4294967040  ;;  %v1012_v0 = vmov 0.0   ;;  %vm1013_vm0 = vmmov 0   ;;  %v777_v1 = vld [vmem:[#allocation5] sm:$0xff]   ;;  %vm303_vm1 = vcmask 130048  }
  0x88   : > { %671 = vmatprep.subr.bf16.mxu0 %v1012_v0  ;;  %673 = vmatprep.mubr.msk.bf16.mxu0 %vm1013_vm0, %v1012_v0  ;;  %v294_v2 = vld [vmem:[%s249_s17] sm:$0xf]  ;;  %v348_v3 = vld [vmem:[#allocation7] sm:$0xf]  ;;  %vm353_vm2 = vcmask 1043456   ;;  %v778_v5 = vld [vmem:[#allocation8] sm:$0xff]  }
  0x89   : > { %677 = vmatprep.subr.bf16.mxu1 %v1012_v0  ;;  %679 = vmatprep.mubr.msk.bf16.mxu1 %vm1013_vm0, %v1012_v0  ;;  %v355_v4 = vsel %vm353_vm2, %v348_v3, 0  ;;  %vm349_vm3 = vcmask 64512   ;;  %v779_v11 = vld [vmem:[#allocation8 + $0x8] sm:$0xff]   ;;  %vm415_vm4 = vcmask 261120   ;;  %vm471_vm5 = vcmask 257024   ;;  %s285_s24 = scalar_lea.vmem [#allocation10], %s646_s28 }
  0x8a   : > { %672 = vmatpush3.bf16.msra.mxu0 %v777_v1  ;;  %678 = vmatpush3.bf16.msra.mxu1 %v355_v4  ;;  %vm459_vm6 = vcmask 31744   ;;  %s660_s26 = sshll.u32 %s1067_s22, 6  ;;  %s493_s16 = sshll.u32 %s285_s24, 4  ;;  %s494_s16 = int_to_ptr.vmem [resolvable:$true] %s493_s16 }
  0x8b   : > { %683 = vmatprep.subr.bf16.mxu0 %v1012_v0  ;;  %s1268_s15 = scalar_lea.hbm %s1342_s4, %s660_s26  ;;  %s475_s10 = scalar_lea.sflag [#allocation4], %s1242_s6 }
  0x8c   : > { %s898_s8 = scalar_lea.vmem %s494_s16, 64  ;;  %s1014_s9 = smov [#allocation10]  }
  0x8d   : > { %674 = vmatmul.mubr.msk.bf16.vlgmr.msra.gmra.mrb[0].mxu0 %vm303_vm1, %v294_v2  ;;  %p899_p10 = scmp.ne.s32.totalorder %s494_s16, %s898_s8  ;;  %s902_s23 = sshll.u32 %s1014_s9, 4  ;;  %s903_s23 = int_to_ptr.vmem [resolvable:$false] %s902_s23 }
  0x8e   : > { %687 = vmatprep.mubr.msk.bf16.mxu0 %vm1013_vm0, %v1012_v0  ;;  %684 = vmatpush3.bf16.msra.mxu0 %v778_v5  ;;  %s904_s27 = scalar_lea.vmem %s903_s23, 128  ;;  %p905_p12 = scmp.lt.s32.totalorder %s494_s16, %s903_s23 }
  0x8f   : > { %685 = vmatprep.subr.bf16.mxu0 %v1012_v0  ;;  %p900_p3 = pnand %p899_p10, %p1197_p5  ;;  %p906_p1 = scmp.lt.s32.totalorder %s904_s27, %s898_s8 }
  0x91   : > { %p901_p7 = pneg %p900_p3  ;;  %p907_p2 = por %p906_p1, %p905_p12 }
  0x92   : > { %686 = vmatpush3.bf16.msra.mxu0 %v779_v11 }
  0x93   : > { %p908_p4 = pnand %p907_p2, %p901_p7 }
 0x160   : > { %v341_v6 = vpop.f32.mrb[0].mxu0 }
 0x161   : > { %v347_v7 = vpack.c.bf16 %v341_v6, %v341_v6  ;;  %v675_v8 = vpop.f32.mrb[1].mxu0 }
 0x162   : > { %v344_v9 = vpop.f32.mrb[2].mxu0 }
 0x163   : > { %v676_v10 = vpop.f32.mrb[3].mxu0  ;;  %680 = vmatmul.mubr.msk.bf16.vlgmr.msra.gmra.mrb[0].mxu1 %vm349_vm3, %v347_v7 }
 0x236   : > { %v391_v12 = vpop.f32.mrb[0].mxu1 }
 0x237   : > { %v397_v13 = vmax.f32 %v391_v12, 0.0  ;;  %v681_v14 = vpop.f32.mrb[1].mxu1 }
 0x238   : > { %v394_v15 = vpop.f32.mrb[2].mxu1 }
 0x239   : > { %v398_v16 = vpack.c.bf16 %v397_v13, %v397_v13  ;;  %v682_v17 = vpop.f32.mrb[3].mxu1 }
 0x23b   : > { %688 = vmatmul.mubr.msk.bf16.vlgmr.msra.gmra.mrb[4].mxu0 %vm415_vm4, %v398_v16  ;;  %472 = vst.msk [vmem:[%s285_s24] sm:$0xf] %vm471_vm5, %v398_v16 }
 0x30e   : > { %v453_v18 = vpop.f32.mrb[4].mxu0 }
 0x30f   : > { %v689_v19 = vpop.f32.mrb[5].mxu0  ;;  %v460_v20 = vsel %vm459_vm6, %v453_v18, -inf }
 0x310   : > { %461 = vmax.xlane.f32.xlu0 %v460_v20  ;;  %v456_v21 = vpop.f32.mrb[6].mxu0 }
 0x311   : > { %v690_v22 = vpop.f32.mrb[7].mxu0 }
 0x39d   : > { %v462_v23 = vpop.xlane.xlu0 %461 }
 0x39e   : > { %v463_v24 = vsub.f32 %v453_v18, %v462_v23 }
 0x3a0   : > { %v464_v25 = vmul.f32 1.442695, %v463_v24 }
 0x3a2   : > { %780 = vpow2.f32 %v464_v25 }
 0x3ac   : > { %v781_v26 = vpop.eup %780 }
 0x3ad   : > { %v466_v27 = vsel %vm459_vm6, %v781_v26, 0.0 }
 0x3ae   : > { %467 = vadd.xlane.f32.xlu0 %v466_v27 }
 0x3af   : > { %911 = shalt.err (!%p908_p4)
}
 0x3b0   : > { %s912_s12 = scalar_lea.hbm %s1268_s15, 64  ;;  %s916_s17 = scalar_lea.hbm %s1342_s4, 128 }
 0x3b1   : > { %p913_p0 = scmp.ne.s32.totalorder %s1268_s15, %s912_s12  ;;  %p917_p8 = scmp.lt.u32.totalorder %s1268_s15, %s1342_s4 }
 0x3b2   : > { %p918_p13 = scmp.lt.u32.totalorder %s916_s17, %s912_s12  ;;  %p920_p10 = scmp.lt.u32.totalorder %s912_s12, %s1268_s15 }
 0x3b3   : > { %p914_p9 = pnand %p913_p0, %p1197_p5 }
 0x3b4   : > { %p919_p6 = por %p918_p13, %p917_p8 }
 0x3b5   : > { %p915_p11 = pneg %p914_p9 }
 0x3b6   : > { %p921_p3 = por %p920_p10, %p919_p6 }
 0x3b8   : > { %p922_p7 = pnand %p921_p3, %p915_p11 }
 0x3ba   : > { %925 = shalt.err (!%p922_p7)
}
 0x3bb   : > { %705 = dma.vmem_to_hbm [thread:$0]  (%p1197_p5), %s494_s16, 64, %s1268_s15, %s475_s10  }
 0x3bc   : > { %s651_s11 = sshll.u32 %s1242_s6, 3  ;;  %s661_s13 = sshll.u32 %s1067_s22, 7 }
 0x3bd   : > { %s292_s8 = scalar_lea.vmem [#allocation11], %s651_s11  ;;  %s1293_s12 = scalar_lea.hbm %s1343_s5, %s661_s13 }
 0x3be   : > { %s506_s9 = sshll.u32 %s292_s8, 4  ;;  %s480_s15 = scalar_lea.sflag [#allocation12], %s1242_s6  ;;  %s1295_s9 = int_to_ptr.vmem [resolvable:$true] %s506_s9 }
 0x3bf   : > { %s926_s16 = scalar_lea.vmem %s1295_s9, 128  ;;  %s1015_s22 = smov [#allocation11]  }
 0x3c0   : > { %p927_p12 = scmp.ne.s32.totalorder %s1295_s9, %s926_s16  ;;  %s930_s10 = sshll.u32 %s1015_s22, 4  ;;  %s931_s10 = int_to_ptr.vmem [resolvable:$false] %s930_s10 }
 0x3c1   : > { %s932_s28 = scalar_lea.vmem %s931_s10, 256  ;;  %p933_p4 = scmp.lt.s32.totalorder %s1295_s9, %s931_s10 }
 0x3c2   : > { %p928_p1 = pnand %p927_p12, %p1197_p5  ;;  %p934_p0 = scmp.lt.s32.totalorder %s932_s28, %s926_s16 }
 0x3c4   : > { %p929_p2 = pneg %p928_p1  ;;  %p935_p9 = por %p934_p0, %p933_p4 }
 0x3c6   : > { %p936_p11 = pnand %p935_p9, %p929_p2 }
 0x43b   : > { %v468_v28 = vpop.xlane.xlu0 %467 }
 0x43c   : > { %782 = vrcp.f32 %v468_v28 }
 0x446   : > { %v783_v29 = vpop.eup %782 }
 0x447   : > { %v470_v30 = vmul.f32 %v783_v29, %v781_v26 }
 0x449   : > { %473 = vst.msk [vmem:[%s292_s8] sm:$0xff] %vm459_vm6, %v470_v30 }
 0x44a   : > { %939 = shalt.err (!%p936_p11)
}
 0x44b   : > { %s940_s6 = scalar_lea.hbm %s1293_s12, 128  ;;  %s944_s24 = scalar_lea.hbm %s1343_s5, 256 }
 0x44c   : > { %p941_p8 = scmp.ne.s32.totalorder %s1293_s12, %s940_s6  ;;  %p945_p10 = scmp.lt.u32.totalorder %s1293_s12, %s1343_s5 }
 0x44d   : > { %p946_p3 = scmp.lt.u32.totalorder %s944_s24, %s940_s6  ;;  %p948_p12 = scmp.lt.u32.totalorder %s940_s6, %s1293_s12 }
 0x44e   : > { %p942_p13 = pnand %p941_p8, %p1197_p5 }
 0x44f   : > { %p947_p7 = por %p946_p3, %p945_p10 }
 0x450   : > { %p943_p6 = pneg %p942_p13 }
 0x451   : > { %p949_p1 = por %p948_p12, %p947_p7 }
 0x453   : > { %p950_p2 = pnand %p949_p1, %p943_p6 }
 0x455   : > { %953 = shalt.err (!%p950_p2)
}
 0x456   : > { %706 = dma.vmem_to_hbm [thread:$0]  (%p1197_p5), %s1295_s9, 128, %s1293_s12, %s480_s15  }
 0x457 PF: > { %s518_s13 = sand.u32 1, %s992_s18   ;;  %p1361_p4 = scmp.ne.s32.totalorder %s1348_s25, 0 }
 0x458   : > { %p1362_p0 = scmp.ge.s32.totalorder %s1004_s21, 2  ;;  %s519_s8 = scalar_lea.sflag [#allocation4], %s518_s13 }
 0x45a   : > { %p724_p9 = pnand %p1362_p0, %p1361_p4 }
 0x45c   : > { %983 = dma.done.wait (!%p724_p9), %s519_s8, 64  }
 0x45d   : > { %985 = vsyncadd (!%p724_p9), %s519_s8, 4294967232  ;;  %s528_s23 = scalar_lea.sflag [#allocation12], %s518_s13 }
 0x45e   : > { %987 = dma.done.wait (!%p724_p9), %s528_s23, 128  }
 0x45f   : > { %989 = vsyncadd (!%p724_p9), %s528_s23, 4294967168  ;;  %p24_p5 = scmp.ge.s32.totalorder %s1183_s14, 4   ;;  %s1363_s18 = smov %s996_s19 }
 0x460   : > { %s1364_s19 = smov %s1000_s20  ;;  %s1365_s20 = smov %s1193_s30 }
 0x461   : > { %s1366_s21 = smov %s1183_s14  ;;  %26 = sbr.rel (!%p24_p5) target bundleno = 9 (0x9), region = 110 }
 0x468   :  { %533 = vsyncpa [#allocation3], 1 }
 0x469   :  { %535 = vsyncpa [#allocation3 + $0x1], 1 }
 0x46a   :  { %536 = vsyncpa [#allocation6], 1 }
 0x46b   :  { %537 = vsyncpa [#allocation9], 1 }
 0x46c   :  { %538 = vsyncpa [#allocation4], 1 }
 0x46d   :  { %540 = vsyncpa [#allocation4 + $0x1], 1 }
 0x46e   :  { %541 = vsyncpa [#allocation12], 1 }
 0x46f   :  { %543 = vsyncpa [#allocation12 + $0x1], 1 }

</bundles_post_ra>
